<compile_context>
chip_gen: v5e
topology: v5e:2x2
jax: 0.10.0
libtpu: 0.0.40
codegen_flags: <defaults>
</compile_context>

<pallas_src>
import functools

import numpy as np
import jax
import jax.numpy as jnp
from jax import lax
from jax.experimental import pallas as pl
from jax.experimental.pallas import tpu as pltpu


# ----------------------------------------------------------------------------
# Pallas kernel 1: Sobel edge detector (getEdge). Matches valid 3x3
# cross-correlation + magnitude + F.pad(..., (1,1,1,1), 0); emits |cos(theta)|
# and |sin(theta)| directly instead of gx/gy/theta (same downstream semantics:
# the sampler only uses abs(cos(theta)) / abs(sin(theta)), and atan2(0,0)=0 at
# flat / border pixels maps to cos=1, sin=0).
# ----------------------------------------------------------------------------
def _sobel_kernel(xp_ref, e_ref, c_ref, s_ref):
    xp = xp_ref[0]                                 # (H+2, W+2) zero-padded slab
    Hp, Wp = xp.shape
    H, W = Hp - 2, Wp - 2

    def nb(dr, dc):                                # x[r+dr, c+dc] (zero outside)
        return xp[1 + dr:1 + dr + H, 1 + dc:1 + dc + W]

    tl, tc, tr = nb(-1, -1), nb(-1, 0), nb(-1, 1)
    ml, mr = nb(0, -1), nb(0, 1)
    bl, bc, br = nb(1, -1), nb(1, 0), nb(1, 1)

    # Sobel-x [[-1,0,1],[-2,0,2],[-1,0,1]]  (F.conv2d = cross-correlation)
    gx = (tr - tl) + 2.0 * (mr - ml) + (br - bl)
    # Sobel-y [[1,2,1],[0,0,0],[-1,-2,-1]]
    gy = (tl + 2.0 * tc + tr) - (bl + 2.0 * bc + br)
    mag = jnp.sqrt(gx * gx + gy * gy)

    rows = lax.broadcasted_iota(jnp.int32, (H, W), 0)
    cols = lax.broadcasted_iota(jnp.int32, (H, W), 1)
    interior = jnp.logical_and(
        jnp.logical_and(rows > 0, rows < H - 1),
        jnp.logical_and(cols > 0, cols < W - 1))

    nz = jnp.logical_and(interior, mag > 0.0)
    safe = jnp.where(mag > 0.0, mag, 1.0)
    # |cos(atan2(gy,gx))| = |gx|/|g| ; theta == 0 (border / flat) -> cos=1, sin=0.
    abs_cos = jnp.where(nz, jnp.abs(gx) / safe, 1.0)
    abs_sin = jnp.where(nz, jnp.abs(gy) / safe, 0.0)

    # Single lane-dense full store per output (no zero-init + partial rewrite).
    e_ref[0] = jnp.where(interior, mag, 0.0)
    c_ref[0] = abs_cos
    s_ref[0] = abs_sin


def sobel_edges(x_nhw):
    """x_nhw: (N, H, W) float32 -> (edges, |cos(theta)|, |sin(theta)|), each (N, H, W)."""
    x_nhw = jnp.asarray(x_nhw, jnp.float32)
    N, H, W = x_nhw.shape
    # Zero-pad once in XLA so the kernel only takes static slices (no in-kernel
    # concatenate / pad, which is the most fragile lowering path).
    xp = jnp.pad(x_nhw, ((0, 0), (1, 1), (1, 1)))
    in_spec = pl.BlockSpec((1, H + 2, W + 2), lambda i: (i, 0, 0))
    out_spec = pl.BlockSpec((1, H, W), lambda i: (i, 0, 0))
    out_shape = tuple(jax.ShapeDtypeStruct((N, H, W), jnp.float32) for _ in range(3))
    # TODO(synk): for very large frames (e.g. 1080x1920 on v7x, 64 MiB VMEM) tile
    # H into row chunks with a 1-row halo; the full-slab block is fine at test sizes.
    return pl.pallas_call(
        _sobel_kernel,
        grid=(N,),
        in_specs=[in_spec],
        out_specs=(out_spec, out_spec, out_spec),
        out_shape=out_shape,
        compiler_params=pltpu.CompilerParams(dimension_semantics=("parallel",)),
    )(xp)


# ----------------------------------------------------------------------------
# Pallas kernel 2: ranking-loss elementwise math + reductions over sampled
# pairs, tiled over the row axis with VMEM-resident accumulator outputs.
# ----------------------------------------------------------------------------
_LANE = 128
_ROW_TILE = 512          # rows per grid step: 6 x (512,128) f32 x 2 bufs = 3 MiB
_MIN_ELEMS = 8 * _LANE   # minimum bucket (8 sublanes x 128 lanes)


def _bucket_size(n):
    """Next power of two >= n (min _MIN_ELEMS) -> stable pallas_call shapes."""
    return max(_MIN_ELEMS, 1 << max(n - 1, 0).bit_length())


def _ranking_kernel(len_ref, iA_ref, iB_ref, tA_ref, tB_ref, mA_ref, mB_ref,
                    eq_ref, uneq_ref, cnt_ref, *, sigma):
    k = pl.program_id(0)

    @pl.when(k == 0)
    def _():
        eq_ref[...] = jnp.zeros_like(eq_ref)
        uneq_ref[...] = jnp.zeros_like(uneq_ref)
        cnt_ref[...] = jnp.zeros_like(cnt_ref)

    rows, lanes = iA_ref.shape
    n_valid = len_ref[0]
    base = k * (rows * lanes)
    r_iota = lax.broadcasted_iota(jnp.int32, (rows, lanes), 0)
    c_iota = lax.broadcasted_iota(jnp.int32, (rows, lanes), 1)
    in_range = (base + r_iota * lanes + c_iota) < n_valid

    iA = iA_ref[...]
    iB = iB_ref[...]
    # Exactly the torch formula: ratio = (tA + 1e-6) / (tB + 1e-6).
    ratio = (tA_ref[...] + 1e-6) / (tB_ref[...] + 1e-6)
    hi = 1.0 + sigma
    lo = 1.0 / (1.0 + sigma)
    mask_eq = jnp.logical_and(ratio < hi, ratio > lo)
    labels = (jnp.where(ratio >= hi, 1.0, 0.0)
              - jnp.where(ratio <= lo, 1.0, 0.0))
    cons = jnp.logical_and((mA_ref[...] * mB_ref[...]) > 0.5, in_range)

    diff = iA - iB
    eq_elems = jnp.where(jnp.logical_and(mask_eq, cons), diff * diff, 0.0)
    # Numerically stable softplus(x) = max(x, 0) + log(1 + exp(-|x|)); avoids the
    # exp overflow present in the torch reference (identical value otherwise).
    x = (iB - iA) * labels
    softplus = jnp.maximum(x, 0.0) + jnp.log(1.0 + jnp.exp(-jnp.abs(x)))
    uneq_elems = jnp.where(
        jnp.logical_and(jnp.logical_not(mask_eq), cons), softplus, 0.0)

    eq_ref[...] += jnp.sum(eq_elems)
    uneq_ref[...] += jnp.sum(uneq_elems)
    cnt_ref[...] += jnp.sum(jnp.where(cons, 1.0, 0.0))


def ranking_sums(iA, iB, tA, tB, mA, mB, n_valid, sigma):
    """Inputs: 1-D device arrays of identical bucketed length Lp (multiple of
    1024); n_valid <= Lp real pairs. Returns (equal_sum, unequal_sum, count)."""
    Lp = int(iA.shape[0])
    R = Lp // _LANE
    TR = min(_ROW_TILE, R)
    grid = (R // TR,)

    def shape2d(x):
        return jnp.asarray(x, jnp.float32).reshape(R, _LANE)

    args = (jnp.array([n_valid], jnp.int32),
            shape2d(iA), shape2d(iB), shape2d(tA), shape2d(tB),
            shape2d(mA), shape2d(mB))

    in_spec = pl.BlockSpec((TR, _LANE), lambda k, n: (k, 0))
    out_spec = pl.BlockSpec((1, 1), lambda k, n: (0, 0))   # resident accumulator
    out_shape = tuple(jax.ShapeDtypeStruct((1, 1), jnp.float32) for _ in range(3))

    eq, uneq, cnt = pl.pallas_call(
        functools.partial(_ranking_kernel, sigma=sigma),
        grid_spec=pltpu.PrefetchScalarGridSpec(
            num_scalar_prefetch=1,
            grid=grid,
            in_specs=[in_spec] * 6,
            out_specs=(out_spec, out_spec, out_spec),
        ),
        out_shape=out_shape,
        compiler_params=pltpu.CompilerParams(
            dimension_semantics=("arbitrary",)),
    )(*args)
    return eq[0, 0], uneq[0, 0], cnt[0, 0]


# ----------------------------------------------------------------------------
# EdgeguidedRankingLoss (forward only). Sampling glue stays on host (numpy RNG,
# deterministic seed) because the reference uses dynamic-shape masked selects;
# only int32 index arrays are uploaded, all gathers / loss math run on device.
# ----------------------------------------------------------------------------
class EdgeguidedRankingLossPallas:
    def __init__(self, point_pairs=5000, sigma=0.03, alpha=1.0, mask_value=1e-6,
                 loss_weight=1.0, seed=0):
        self.point_pairs = point_pairs
        self.sigma = sigma
        self.alpha = alpha
        self.mask_value = mask_value
        self.loss_weight = loss_weight
        self.eps = 1e-6
        self._rng = np.random.default_rng(seed)

    # getEdge: channel 0 when C==3 (matches reference), identical for C==1.
    def get_edge(self, images):
        images = jnp.asarray(images, jnp.float32)
        return sobel_edges(images[:, 0, :, :])

    def _edge_guided_sample_indices(self, edges, abs_cos, abs_sin, h, w):
        rng = self._rng
        edges_max = float(edges.max())
        edges_mask = edges >= edges_max * 0.1
        edges_loc = np.nonzero(edges_mask)[0]
        minlen = int(edges_loc.shape[0])
        if minlen == 0:                       # guard: no edge pixels
            return np.zeros((0,), np.int64), np.zeros((0,), np.int64), 0
        sample_num = minlen
        index_anchors = rng.integers(0, minlen, size=(sample_num,))
        anchor_idx = edges_loc[index_anchors]
        abscos_a = abs_cos[anchor_idx]
        abssin_a = abs_sin[anchor_idx]
        row_anchors = anchor_idx // w
        col_anchors = anchor_idx % w
        distance_matrix = rng.integers(2, 40, size=(4, sample_num)).astype(np.float32)
        pos_or_neg = np.ones((4, sample_num), np.float32)
        pos_or_neg[:2, :] = -pos_or_neg[:2, :]
        distance_matrix = distance_matrix * pos_or_neg
        col = col_anchors[None, :].astype(np.int64) + np.round(
            distance_matrix * abscos_a[None, :]).astype(np.int64)
        row = row_anchors[None, :].astype(np.int64) + np.round(
            distance_matrix * abssin_a[None, :]).astype(np.int64)
        col = np.clip(col, 0, w - 1)
        row = np.clip(row, 0, h - 1)
        a = row[0] * w + col[0]
        b = row[1] * w + col[1]
        c = row[2] * w + col[2]
        d = row[3] * w + col[3]
        A = np.concatenate([a, b, c])
        B = np.concatenate([b, c, d])
        return A, B, sample_num

    def _random_sample_indices(self, sel, sample_num):
        rng = self._rng
        sel_loc = np.nonzero(sel)[0]
        num_effect = int(sel_loc.shape[0])
        perm = rng.permutation(num_effect)
        idxA = perm[0:sample_num * 2:2]
        idxB = perm[1:sample_num * 2:2]
        if idxA.shape[0] > idxB.shape[0]:
            idxA = idxA[:-1]
        return sel_loc[idxA], sel_loc[idxB]

    def __call__(self, prediction, target, mask=None, input=None):
        pred = jnp.asarray(prediction, jnp.float32)
        tgt = jnp.asarray(target, jnp.float32)
        n, c, h, w = tgt.shape
        if mask is None:
            mask = tgt > self.mask_value

        # Sobel on the guidance image only. The reference also computes
        # getEdge(target) but never uses the result, so that pass is skipped.
        edges_img, abscos_img, abssin_img = self.get_edge(input)

        pred_flat = pred.reshape(-1)
        tgt_flat = tgt.reshape(-1)
        mask_flat = jnp.asarray(mask, jnp.float32).reshape(-1)

        # Host-side data-dependent sampling (dynamic nonzero / randperm / randint).
        edges_np = np.asarray(edges_img).reshape(n, -1)
        abscos_np = np.asarray(abscos_img).reshape(n, -1)
        abssin_np = np.asarray(abssin_img).reshape(n, -1)
        sel_np = np.asarray(tgt_flat > self.mask_value).reshape(n, -1)

        hw = h * w
        A_parts, B_parts = [], []
        for i in range(n):
            A_e, B_e, sn = self._edge_guided_sample_indices(
                edges_np[i], abscos_np[i], abssin_np[i], h, w)
            if sn == 0:
                continue
            A_r, B_r = self._random_sample_indices(sel_np[i], sn)
            A_parts.append(np.concatenate([A_e, A_r]) + i * hw)
            B_parts.append(np.concatenate([B_e, B_r]) + i * hw)

        if A_parts:
            A_all = np.concatenate(A_parts)
            B_all = np.concatenate(B_parts)
        else:
            A_all = np.zeros((0,), np.int64)
            B_all = np.zeros((0,), np.int64)

        # Pad index arrays to a fixed power-of-two bucket so every device op
        # (gathers + the Pallas ranking kernel) keeps a stable compile shape.
        L = int(A_all.shape[0])
        Lp = _bucket_size(L)
        A_pad = jnp.asarray(np.pad(A_all, (0, Lp - L)).astype(np.int32))
        B_pad = jnp.asarray(np.pad(B_all, (0, Lp - L)).astype(np.int32))

        # Gathers stay on device: only int32 indices were uploaded.
        iA = jnp.take(pred_flat, A_pad)
        iB = jnp.take(pred_flat, B_pad)
        tA = jnp.take(tgt_flat, A_pad)
        tB = jnp.take(tgt_flat, B_pad)
        mA = jnp.take(mask_flat, A_pad)
        mB = jnp.take(mask_flat, B_pad)

        # Single launch for all batch elements (alpha is constant, so summing the
        # per-image terms globally is exactly the reference accumulation).
        eq_sum, uneq_sum, cnt = ranking_sums(iA, iB, tA, tB, mA, mB, L, self.sigma)
        loss = (self.alpha * eq_sum + uneq_sum) / (cnt + self.eps)
        loss = loss * self.loss_weight
        if bool(jnp.isnan(loss)) or bool(jnp.isinf(loss)):
            raise RuntimeError(f"VNL error, {loss}")
        return loss


if __name__ == "__main__":
    key = jax.random.PRNGKey(0)
    k1, k2, k3 = jax.random.split(key, 3)
    N, H, W = 2, 16, 16
    prediction = jax.random.uniform(k1, (N, 1, H, W), jnp.float32, 0.1, 2.0)
    target = jax.random.uniform(k2, (N, 1, H, W), jnp.float32, 0.0, 2.0)
    rgb = jax.random.uniform(k3, (N, 3, H, W), jnp.float32, 0.0, 255.0)

    loss_fn = EdgeguidedRankingLossPallas(point_pairs=5000, sigma=0.03, alpha=1.0,
                                          mask_value=1e-6, loss_weight=1.0, seed=0)
    loss = loss_fn(prediction, target, mask=None, input=rgb)
    jax.block_until_ready(loss)
    print("KERNEL_OK")
</pallas_src>

<mosaic_0001>
module attributes {stable_mosaic.version = 11 : i64} {
  func.func @_sobel_kernel(%arg0: i32, %arg1: memref<1x18x18xf32, #tpu.memory_space<vmem>>, %arg2: memref<1x16x16xf32, #tpu.memory_space<vmem>>, %arg3: memref<1x16x16xf32, #tpu.memory_space<vmem>>, %arg4: memref<1x16x16xf32, #tpu.memory_space<vmem>>) attributes {dimension_semantics = [#tpu.dimension_semantics<parallel>], iteration_bounds = array<i64: 2>, scalar_prefetch = 0 : i64, scratch_operands = 0 : i64, tpu.core_type = #tpu.core_type<tc>, window_params = [{transform_indices = @transform_0, window_bounds = array<i64: 1, 18, 18>}, {transform_indices = @transform_1, window_bounds = array<i64: 1, 16, 16>}, {transform_indices = @transform_2, window_bounds = array<i64: 1, 16, 16>}, {transform_indices = @transform_3, window_bounds = array<i64: 1, 16, 16>}]} {
    %c0 = arith.constant 0 : index
    %c0_0 = arith.constant 0 : index
    %c0_1 = arith.constant 0 : index
    %0 = vector.load %arg1[%c0, %c0_0, %c0_1] : memref<1x18x18xf32, #tpu.memory_space<vmem>>, vector<1x18x18xf32>
    %1 = vector.shape_cast %0 : vector<1x18x18xf32> to vector<18x18xf32>
    %2 = vector.extract_strided_slice %1 {offsets = [0, 0], sizes = [16, 16], strides = [1, 1]} : vector<18x18xf32> to vector<16x16xf32>
    %3 = vector.extract_strided_slice %1 {offsets = [0, 1], sizes = [16, 16], strides = [1, 1]} : vector<18x18xf32> to vector<16x16xf32>
    %4 = vector.extract_strided_slice %1 {offsets = [0, 2], sizes = [16, 16], strides = [1, 1]} : vector<18x18xf32> to vector<16x16xf32>
    %5 = vector.extract_strided_slice %1 {offsets = [1, 0], sizes = [16, 16], strides = [1, 1]} : vector<18x18xf32> to vector<16x16xf32>
    %6 = vector.extract_strided_slice %1 {offsets = [1, 2], sizes = [16, 16], strides = [1, 1]} : vector<18x18xf32> to vector<16x16xf32>
    %7 = vector.extract_strided_slice %1 {offsets = [2, 0], sizes = [16, 16], strides = [1, 1]} : vector<18x18xf32> to vector<16x16xf32>
    %8 = vector.extract_strided_slice %1 {offsets = [2, 1], sizes = [16, 16], strides = [1, 1]} : vector<18x18xf32> to vector<16x16xf32>
    %9 = vector.extract_strided_slice %1 {offsets = [2, 2], sizes = [16, 16], strides = [1, 1]} : vector<18x18xf32> to vector<16x16xf32>
    %10 = arith.subf %4, %2 : vector<16x16xf32>
    %11 = arith.subf %6, %5 : vector<16x16xf32>
    %cst = arith.constant 2.000000e+00 : f32
    %12 = vector.broadcast %cst : f32 to vector<16x16xf32>
    %13 = arith.mulf %12, %11 : vector<16x16xf32>
    %14 = arith.addf %10, %13 : vector<16x16xf32>
    %15 = arith.subf %9, %7 : vector<16x16xf32>
    %16 = arith.addf %14, %15 : vector<16x16xf32>
    %cst_2 = arith.constant 2.000000e+00 : f32
    %17 = vector.broadcast %cst_2 : f32 to vector<16x16xf32>
    %18 = arith.mulf %17, %3 : vector<16x16xf32>
    %19 = arith.addf %2, %18 : vector<16x16xf32>
    %20 = arith.addf %19, %4 : vector<16x16xf32>
    %cst_3 = arith.constant 2.000000e+00 : f32
    %21 = vector.broadcast %cst_3 : f32 to vector<16x16xf32>
    %22 = arith.mulf %21, %8 : vector<16x16xf32>
    %23 = arith.addf %7, %22 : vector<16x16xf32>
    %24 = arith.addf %23, %9 : vector<16x16xf32>
    %25 = arith.subf %20, %24 : vector<16x16xf32>
    %26 = arith.mulf %16, %16 : vector<16x16xf32>
    %27 = arith.mulf %25, %25 : vector<16x16xf32>
    %28 = arith.addf %26, %27 : vector<16x16xf32>
    %29 = math.sqrt %28 : vector<16x16xf32>
    %30 = tpu.iota {dimensions = array<i32: 0>} : vector<16x16xi32>
    %31 = tpu.iota {dimensions = array<i32: 1>} : vector<16x16xi32>
    %c0_i32 = arith.constant 0 : i32
    %32 = vector.broadcast %c0_i32 : i32 to vector<16x16xi32>
    %33 = arith.cmpi sgt, %30, %32 : vector<16x16xi32>
    %c15_i32 = arith.constant 15 : i32
    %34 = vector.broadcast %c15_i32 : i32 to vector<16x16xi32>
    %35 = arith.cmpi slt, %30, %34 : vector<16x16xi32>
    %36 = arith.andi %33, %35 : vector<16x16xi1>
    %c0_i32_4 = arith.constant 0 : i32
    %37 = vector.broadcast %c0_i32_4 : i32 to vector<16x16xi32>
    %38 = arith.cmpi sgt, %31, %37 : vector<16x16xi32>
    %c15_i32_5 = arith.constant 15 : i32
    %39 = vector.broadcast %c15_i32_5 : i32 to vector<16x16xi32>
    %40 = arith.cmpi slt, %31, %39 : vector<16x16xi32>
    %41 = arith.andi %38, %40 : vector<16x16xi1>
    %42 = arith.andi %36, %41 : vector<16x16xi1>
    %cst_6 = arith.constant 0.000000e+00 : f32
    %43 = vector.broadcast %cst_6 : f32 to vector<16x16xf32>
    %44 = arith.cmpf ogt, %29, %43 : vector<16x16xf32>
    %45 = arith.andi %42, %44 : vector<16x16xi1>
    %cst_7 = arith.constant 0.000000e+00 : f32
    %46 = vector.broadcast %cst_7 : f32 to vector<16x16xf32>
    %47 = arith.cmpf ogt, %29, %46 : vector<16x16xf32>
    %cst_8 = arith.constant 1.000000e+00 : f32
    %48 = vector.broadcast %cst_8 : f32 to vector<16x16xf32>
    %49 = arith.select %47, %29, %48 : vector<16x16xi1>, vector<16x16xf32>
    %50 = math.absf %16 : vector<16x16xf32>
    %51 = arith.divf %50, %49 : vector<16x16xf32>
    %cst_9 = arith.constant 1.000000e+00 : f32
    %52 = vector.broadcast %cst_9 : f32 to vector<16x16xf32>
    %53 = arith.select %45, %51, %52 : vector<16x16xi1>, vector<16x16xf32>
    %54 = math.absf %25 : vector<16x16xf32>
    %55 = arith.divf %54, %49 : vector<16x16xf32>
    %cst_10 = arith.constant 0.000000e+00 : f32
    %56 = vector.broadcast %cst_10 : f32 to vector<16x16xf32>
    %57 = arith.select %45, %55, %56 : vector<16x16xi1>, vector<16x16xf32>
    %cst_11 = arith.constant 0.000000e+00 : f32
    %58 = vector.broadcast %cst_11 : f32 to vector<16x16xf32>
    %59 = arith.select %42, %29, %58 : vector<16x16xi1>, vector<16x16xf32>
    %c0_12 = arith.constant 0 : index
    %c0_13 = arith.constant 0 : index
    %c0_14 = arith.constant 0 : index
    %60 = vector.load %arg2[%c0_12, %c0_13, %c0_14] : memref<1x16x16xf32, #tpu.memory_space<vmem>>, vector<1x16x16xf32>
    %61 = vector.shape_cast %60 : vector<1x16x16xf32> to vector<16x16xf32>
    %62 = vector.shape_cast %59 : vector<16x16xf32> to vector<1x16x16xf32>
    tpu.vector_store %arg2[%c0_12, %c0_13, %c0_14], %62 {strides = array<i32>} : memref<1x16x16xf32, #tpu.memory_space<vmem>>, vector<1x16x16xf32>,
    %c0_15 = arith.constant 0 : index
    %c0_16 = arith.constant 0 : index
    %c0_17 = arith.constant 0 : index
    %63 = vector.load %arg3[%c0_15, %c0_16, %c0_17] : memref<1x16x16xf32, #tpu.memory_space<vmem>>, vector<1x16x16xf32>
    %64 = vector.shape_cast %63 : vector<1x16x16xf32> to vector<16x16xf32>
    %65 = vector.shape_cast %53 : vector<16x16xf32> to vector<1x16x16xf32>
    tpu.vector_store %arg3[%c0_15, %c0_16, %c0_17], %65 {strides = array<i32>} : memref<1x16x16xf32, #tpu.memory_space<vmem>>, vector<1x16x16xf32>,
    %c0_18 = arith.constant 0 : index
    %c0_19 = arith.constant 0 : index
    %c0_20 = arith.constant 0 : index
    %66 = vector.load %arg4[%c0_18, %c0_19, %c0_20] : memref<1x16x16xf32, #tpu.memory_space<vmem>>, vector<1x16x16xf32>
    %67 = vector.shape_cast %66 : vector<1x16x16xf32> to vector<16x16xf32>
    %68 = vector.shape_cast %57 : vector<16x16xf32> to vector<1x16x16xf32>
    tpu.vector_store %arg4[%c0_18, %c0_19, %c0_20], %68 {strides = array<i32>} : memref<1x16x16xf32, #tpu.memory_space<vmem>>, vector<1x16x16xf32>,
    return
  }
  func.func @transform_0(%arg0: i32) -> (i32, i32, i32) {
    %c0_i32 = arith.constant 0 : i32
    %c0_i32_0 = arith.constant 0 : i32
    %c0_i32_1 = arith.constant 0 : i32
    return %arg0, %c0_i32, %c0_i32_0 : i32, i32, i32
  }
  func.func @transform_1(%arg0: i32) -> (i32, i32, i32) {
    %c0_i32 = arith.constant 0 : i32
    %c0_i32_0 = arith.constant 0 : i32
    %c0_i32_1 = arith.constant 0 : i32
    return %arg0, %c0_i32, %c0_i32_0 : i32, i32, i32
  }
  func.func @transform_2(%arg0: i32) -> (i32, i32, i32) {
    %c0_i32 = arith.constant 0 : i32
    %c0_i32_0 = arith.constant 0 : i32
    %c0_i32_1 = arith.constant 0 : i32
    return %arg0, %c0_i32, %c0_i32_0 : i32, i32, i32
  }
  func.func @transform_3(%arg0: i32) -> (i32, i32, i32) {
    %c0_i32 = arith.constant 0 : i32
    %c0_i32_0 = arith.constant 0 : i32
    %c0_i32_1 = arith.constant 0 : i32
    return %arg0, %c0_i32, %c0_i32_0 : i32, i32, i32
  }
}

</mosaic_0001>

<bundles_post_ra>
// kernel: tpu_custom_call.1
= control target key start
LH: loop header
LB: loop body
LE: loop exit
PB: predicated region body
PF: predicated region fallthrough
CT: control target
= control target key end

     0   :  { %9 = vsyncpa [#allocation3], 0  ;;  %s1120_s0 = inlined_call_operand.vmem [shape: f32[2,18,18], index: 0, kind: input, shape index: {}]   ;;  %s1121_s1 = inlined_call_operand.hbm [shape: f32[2,16,16], index: 1, kind: output, shape index: {0}]   ;;  %s1122_s2 = inlined_call_operand.hbm [shape: f32[2,16,16], index: 2, kind: output, shape index: {1}]   ;;  %s1123_s3 = inlined_call_operand.hbm [shape: f32[2,16,16], index: 3, kind: output, shape index: {2}]  }
   0x1   :  { %11 = vsyncpa [#allocation3 + $0x1], 0 }
   0x2   :  { %12 = vsyncpa [#allocation5], 0 }
   0x3   :  { %14 = vsyncpa [#allocation5 + $0x1], 0  ;;  %s870_s12 = smov 0   ;;  %s872_s13 = smov 0  }
   0x4   :  { %s874_s14 = smov 0   ;;  %s876_s15 = smov 0  }
   0x5 LB: > { %s891_s16 = sadd.s32 4294967295, %s842_s15   ;;  %s1124_s17 = sadd.s32 4294967294, %s842_s15   ;;  %s842_s15 = sphi %s876_s15, %s1139_s15   ;;  %s838_s14 = sphi %s874_s14, %s1138_s14   ;;  %s834_s13 = sphi %s872_s13, %s1137_s13   ;;  %s830_s12 = sphi %s870_s12, %s1136_s12  }
   0x6   : > { %s895_s18 = sadd.s32 1, %s842_s15   ;;  %s53_s19 = sadd.s32 1, %s838_s14 }
   0x7   : > { %s50_s20 = ssub.s32 %s842_s15, %s895_s18  ;;  %p63_p0 = scmp.ne.s32.totalorder %s838_s14, %s834_s13 }
   0x8   : > { %p51_p1 = scmp.eq.s32.totalorder %s50_s20, 0  ;;  %p64_p2 = scmp.eq.s32.totalorder %s891_s16, 1 }
   0x9   : > { %p69_p3 = scmp.ne.s32.totalorder %s834_s13, %s830_s12  ;;  %p70_p4 = scmp.eq.s32.totalorder %s1124_s17, 1 }
   0xa   : > { %s908_s21 = scalar_select %p51_p1, %s838_s14, %s53_s19  }
   0xb   : > { %p910_p5 = por %p64_p2, %p63_p0  ;;  %p914_p6 = por %p70_p4, %p69_p3 }
   0xc   : > { %p633_p7 = scmp.ge.s32.totalorder %s842_s15, 1  ;;  %p148_p8 = scmp.lt.s32.totalorder %s842_s15, 3 }
   0xe   : > { %p149_p9 = pnand %p633_p7, %p148_p8 }
   0xf   : > { %p182_p10 = scmp.lt.s32.totalorder (!%p149_p9), %s891_s16, 1  ;;  %s844_s29 = smov (!%p149_p9), 126  }
  0x10   : > { %152 = sbr.rel (%p149_p9) target bundleno = 473 (0x1d9), region = 24  ;;  %s845_s30 = smov (!%p149_p9), 127  }
  0x11   : > { %s846_s4 = smov (!%p149_p9), 2   ;;  %s165_s5 = sand.u32 (!%p149_p9), 1, %s834_s13  }
  0x12   : > { %s963_s6 = sshll.u32 (!%p149_p9), %s165_s5, 4  ;;  %s997_s9 = sshll.u32 (!%p149_p9), %s891_s16, 4 }
  0x13   : > { %s978_s7 = scalar_lea.vmem (!%p149_p9), [#allocation2], %s963_s6  ;;  %s992_s8 = scalar_lea.vmem (!%p149_p9), [#allocation6], %s963_s6 }
  0x14   : > { %s174_s10 = scalar_lea.vmem (!%p149_p9), [#allocation4], %s963_s6  ;;  %s467_s19 = scalar_lea.hbm (!%p149_p9), %s1121_s1, %s997_s9 }
  0x15   : > { %s183_s24 = scalar_select %p182_p10, %s891_s16, 1  ;;  %vm224_vm0 = vcmask 1045504   ;;  %vm211_vm1 = vcmask 1046528  }
  0x16   : > { %s485_s11 = sshll.u32 %s174_s10, 4  ;;  %s468_s20 = sshll.u32 %s978_s7, 4  ;;  %s1018_s11 = int_to_ptr.vmem [resolvable:$true] %s485_s11  ;;  %s469_s20 = int_to_ptr.vmem [resolvable:$true] %s468_s20 }
  0x17   : > { %s652_s25 = smul.u32 24, %s183_s24  ;;  %s484_s24 = scalar_lea.hbm %s1122_s2, %s997_s9 }
  0x19   : > { %s186_s28 = scalar_lea.vmem %s1120_s0, %s652_s25  ;;  %s450_s25 = sand.u32 1, %s891_s16  }
  0x1a   : > { %v189_v0 = vld [vmem:[%s186_s28 + $0x10] sm:$0x3]  ;;  %v187_v1 = vld [vmem:[%s186_s28] sm:$0xff]  ;;  %v188_v2 = vld [vmem:[%s186_s28 + $0x8] sm:$0xff]  ;;  %s501_s28 = scalar_lea.hbm %s1123_s3, %s997_s9  ;;  %s1043_s26 = scalar_lea.sflag [#allocation5], %s450_s25 }
  0x1b   : > { %v254_v3 = vmul.f32 2.0, %v189_v0  ;;  %v234_v4 = vmul.f32 2.0, %v187_v1  ;;  %248 = vrot.lane.b32.xlu2 %v188_v2, %s844_s29  ;;  %v235_v5 = vmul.f32 2.0, %v188_v2 }
  0x1d   : > { %256 = vrot.lane.b32.xlu1 %v254_v3, %s845_s30  ;;  %238 = vrot.lane.b32.xlu0 %v234_v4, %s845_s30 }
  0x23   : > { %260 = vrot.lane.b32.xlu2 %v189_v0, %s844_s29 }
  0x25   : > { %246 = vrot.lane.b32.xlu1 %v187_v1, %s844_s29  ;;  %240 = vrot.lane.b32.xlu0 %v235_v5, %s845_s30  ;;  %s1020_s30 = sshll.u32 %s484_s24, 4  ;;  %s1041_s24 = sshll.u32 %s467_s19, 4  ;;  %s488_s30 = int_to_ptr.hbm [resolvable:$true] %s1020_s30  ;;  %s471_s24 = int_to_ptr.hbm [resolvable:$true] %s1041_s24 }
  0x26   : > { %s734_s27 = sshra.s32 %s488_s30, 4  ;;  %s735_s27 = int_to_ptr.hbm [resolvable:$true] %s734_s27 }
  0x27   : > { %s736_s9 = scalar_lea.hbm %s735_s27, 16  ;;  %p741_p0 = scmp.lt.s32.totalorder %s735_s27, %s1122_s2 }
  0x28   : > { %p737_p11 = scmp.ne.s32.totalorder %s735_s27, %s736_s9 }
  0x2a   : > { %p738_p12 = pnand %p737_p11, %p910_p5 }
  0x2b   : > { %201 = vrot.lane.b32.xlu2 %v189_v0, %s846_s4 }
  0x2c   : > { %p739_p13 = pneg %p738_p12 }
  0x2d   : > { %194 = vrot.lane.b32.xlu1 %v188_v2, %s846_s4  ;;  %192 = vrot.lane.b32.xlu0 %v187_v1, %s846_s4 }
  0x75   : > { %v249_v6 = vpop.permute.xlu2 %248 }
  0x7d   : > { %v261_v10 = vpop.permute.xlu2 %260 }
  0x85   : > { %v202_v27 = vpop.permute.xlu2 %201 }
  0x86   : > { %v204_v30 = vsub.f32 %v189_v0, %v202_v27 }
  0x88   : > { %v207_v33 = vmul.f32 2.0, %v204_v30  ;;  %v228_v39 = vrot.slane %v204_v30, 2 }
  0x8a   : > { %v215_v36 = vrot.slane %v207_v33, 1 }
  0x8f   : > { %v257_v7 = vpop.permute.xlu1 %256  ;;  %v239_v8 = vpop.permute.xlu0 %238 }
  0x90   : > { %v259_v9 = vadd.f32 %v257_v7, %v189_v0  ;;  %v244_v11 = vadd.f32 %v239_v8, %v187_v1 }
  0x92   : > { %v263_v14 = vadd.f32 %v261_v10, %v259_v9 }
  0x94   : > { %v270_v18 = vrot.slane %v263_v14, 2  ;;  %v847_v14 = vmov 0  }
  0x97   : > { %v247_v12 = vpop.permute.xlu1 %246  ;;  %v241_v13 = vpop.permute.xlu0 %240 }
  0x98   : > { %v252_v15 = vadd.f32 %v247_v12, %v244_v11  ;;  %v245_v16 = vadd.f32 %v241_v13, %v188_v2 }
  0x9a   : > { %v253_v17 = vadd.f32 %v249_v6, %v245_v16  ;;  %v267_v19 = vrot.slane %v252_v15, 2 }
  0x9c   : > { %v268_v20 = vrot.slane %v253_v17, 2 }
  0x9e   : > { %v271_v21 = vsel %vm224_vm0, %v268_v20, %v270_v18  ;;  %v269_v22 = vsel %vm224_vm0, %v267_v19, %v268_v20 }
  0x9f   : > { %v930_v23 = vsub.f32 %v253_v17, %v271_v21  ;;  %v932_v24 = vsub.f32 %v252_v15, %v269_v22  ;;  %v195_v28 = vpop.permute.xlu1 %194  ;;  %v193_v29 = vpop.permute.xlu0 %192 }
  0xa0   : > { %v199_v31 = vsub.f32 %v188_v2, %v195_v28  ;;  %v198_v32 = vsub.f32 %v187_v1, %v193_v29 }
  0xa1   : > { %v279_v25 = vmul.f32 %v930_v23, %v930_v23  ;;  %v278_v26 = vmul.f32 %v932_v24, %v932_v24 }
  0xa2   : > { %v206_v34 = vmul.f32 2.0, %v199_v31  ;;  %v205_v35 = vmul.f32 2.0, %v198_v32  ;;  %v226_v41 = vrot.slane %v199_v31, 2  ;;  %v225_v43 = vrot.slane %v198_v32, 2 }
  0xa3   : > { %284 = vrot.lane.b32.xlu1 %v279_v25, %s846_s4  ;;  %282 = vrot.lane.b32.xlu0 %v278_v26, %s846_s4  ;;  %s1024_s4 = sshll.u32 %s501_s28, 4  ;;  %s505_s4 = int_to_ptr.hbm [resolvable:$true] %s1024_s4 }
  0xa4   : > { %v213_v37 = vrot.slane %v206_v34, 1  ;;  %v212_v38 = vrot.slane %v205_v35, 1  ;;  %v229_v46 = vsel %vm224_vm0, %v226_v41, %v228_v39  ;;  %v227_v47 = vsel %vm224_vm0, %v225_v43, %v226_v41 }
  0xa6   : > { %v216_v40 = vsel %vm211_vm1, %v213_v37, %v215_v36  ;;  %v214_v42 = vsel %vm211_vm1, %v212_v38, %v213_v37 }
  0xa7   : > { %v220_v44 = vadd.f32 %v216_v40, %v199_v31  ;;  %v219_v45 = vadd.f32 %v214_v42, %v198_v32 }
  0xa9   : > { %v940_v48 = vadd.f32 %v229_v46, %v220_v44  ;;  %v942_v49 = vadd.f32 %v227_v47, %v219_v45  ;;  %v314_v44 = vlaneseq }
  0xab   : > { %v277_v50 = vmul.f32 %v940_v48, %v940_v48  ;;  %v276_v51 = vmul.f32 %v942_v49, %v942_v49  ;;  %v345_v35 = vand.u32 2147483647, %v940_v48  ;;  %v344_v37 = vand.u32 2147483647, %v942_v49 }
  0xac   : > { %v318_v45 = vand.u32 127, %v314_v44  ;;  %v315_v49 = vshrl.u32 %v314_v44, 7 }
  0xae   : > { %vm325_vm0 = vcmp.gt.s32.totalorder %v318_v45, 0  ;;  %vm326_vm1 = vcmp.lt.s32.totalorder %v318_v45, 15 }
 0x115   : > { %v285_v52 = vpop.permute.xlu1 %284  ;;  %v283_v53 = vpop.permute.xlu0 %282 }
 0x116   : > { %v289_v54 = vadd.f32 %v285_v52, %v277_v50  ;;  %v288_v55 = vadd.f32 %v283_v53, %v276_v51 }
 0x118   : > { %708 = vrsqrt.f32 %v289_v54  ;;  %vm309_vm2 = vcmp.eq.f32.partialorder %v289_v54, inf  ;;  %v312_v5 = vand.u32 2147483648, %v289_v54  ;;  %vm311_vm3 = vcmp.eq.f32.partialorder %v289_v54, 0.0 }
 0x119   : > { %710 = vrsqrt.f32 %v288_v55  ;;  %vm297_vm4 = vcmp.eq.f32.partialorder %v288_v55, inf  ;;  %v300_v8 = vand.u32 2147483648, %v288_v55  ;;  %vm299_vm5 = vcmp.eq.f32.partialorder %v288_v55, 0.0 }
 0x11e   : > { %v709_v56 = vpop.eup %708 }
 0x11f   : > { %v711_v57 = vpop.eup %710  ;;  %v303_v58 = vmul.f32 %v709_v56, %v289_v54 }
 0x120   : > { %v291_v59 = vmul.f32 %v711_v57, %v288_v55 }
 0x121   : > { %v304_v60 = vmul.f32 %v709_v56, %v303_v58 }
 0x122   : > { %v292_v61 = vmul.f32 %v711_v57, %v291_v59 }
 0x123   : > { %v305_v62 = vmul.f32 0.5, %v304_v60 }
 0x124   : > { %v293_v63 = vmul.f32 0.5, %v292_v61 }
 0x125   : > { %v306_v0 = vsub.f32 1.5, %v305_v62 }
 0x126   : > { %v294_v1 = vsub.f32 1.5, %v293_v63  ;;  %v386_v63 = vand.u32 2147483647, %v932_v24 }
 0x127   : > { %v307_v2 = vmul.f32 %v709_v56, %v306_v0 }
 0x128   : > { %v295_v3 = vmul.f32 %v711_v57, %v294_v1 }
 0x129   : > { %v308_v4 = vmul.f32 %v307_v2, %v289_v54 }
 0x12a   : > { %v296_v6 = vmul.f32 %v295_v3, %v288_v55 }
 0x12b   : > { %v310_v7 = vsel %vm309_vm2, %v289_v54, %v308_v4  ;;  %vm319_vm2 = vcmp.gt.s32.totalorder %v315_v49, 0 }
 0x12c   : > { %v313_v9 = vsel %vm311_vm3, %v312_v5, %v310_v7  ;;  %v298_v10 = vsel %vm297_vm4, %v288_v55, %v296_v6  ;;  %vm965_vm3 = vmand %vm325_vm0, %vm326_vm1  ;;  %v316_v5 = vadd.s32 8, %v315_v49 }
 0x12d   : > { %vm331_vm6 = vcmp.gt.f32.partialorder %v313_v9, 0.0  ;;  %v301_v11 = vsel %vm299_vm5, %v300_v8, %v298_v10  ;;  %vm971_vm4 = vmand %vm319_vm2, %vm965_vm3 }
 0x12e   : > { %v343_v12 = vsel %vm331_vm6, %v313_v9, 1.0  ;;  %vm330_vm7 = vcmp.gt.f32.partialorder %v301_v11, 0.0  ;;  %v333_v19 = vsel %vm331_vm6, 1, %v847_v14  ;;  %vm438_vm6 = vcmask 130048  }
 0x12f   : > { %712 = vrcp.f32 %v343_v12  ;;  %392 = vrot.lane.b32.xlu0 %v343_v12, %s844_s29  ;;  %v342_v13 = vsel %vm330_vm7, %v301_v11, 1.0  ;;  %v332_v15 = vsel %vm330_vm7, 1, %v847_v14  ;;  %v372_v25 = vand.u32 2147483648, %v343_v12 }
 0x130   : > { %390 = vrot.lane.b32.xlu2 %v342_v13, %s844_s29  ;;  %714 = vrcp.f32 %v342_v13  ;;  %334 = vrot.lane.b32.xlu1 %v332_v15, %s844_s29  ;;  %v357_v26 = vand.u32 2147483648, %v342_v13  ;;  %v370_v28 = vand.u32 2147483647, %v343_v12  ;;  %v355_v30 = vand.u32 2147483647, %v342_v13 }
 0x131   : > { %vm366_vm10 = vweird.f32 %v343_v12  ;;  %vm351_vm11 = vweird.f32 %v342_v13  ;;  %v373_v33 = vor.u32 1.1754944e-38, %v372_v25 }
 0x132   : > { %v358_v34 = vor.u32 1.1754944e-38, %v357_v26  ;;  %vm371_vm14 = vcmp.eq.f32.partialorder %v370_v28, 8.507059e+37  ;;  %vm356_vm15 = vcmp.eq.f32.partialorder %v355_v30, 8.507059e+37 }
 0x135   : > { %v713_v16 = vpop.eup %712 }
 0x136   : > { %v715_v17 = vpop.eup %714  ;;  %v362_v18 = vmul.f32 %v713_v16, %v343_v12  ;;  %vm367_vm8 = vweird.f32 %v713_v16 }
 0x137   : > { %v347_v20 = vmul.f32 %v715_v17, %v342_v13  ;;  %vm352_vm9 = vweird.f32 %v715_v17  ;;  %vm368_vm12 = vmor %vm366_vm10, %vm367_vm8  ;;  %v387_v13 = vand.u32 2147483647, %v930_v23 }
 0x138   : > { %336 = vrot.lane.b32.xlu2 %v333_v19, %s844_s29  ;;  %v363_v21 = vsub.f32 1.0, %v362_v18  ;;  %vm353_vm13 = vmor %vm351_vm11, %vm352_vm9 }
 0x139   : > { %v348_v22 = vsub.f32 1.0, %v347_v20 }
 0x13a   : > { %v364_v27 = vmul.f32 %v713_v16, %v363_v21 }
 0x13b   : > { %v349_v29 = vmul.f32 %v715_v17, %v348_v22 }
 0x13c   : > { %v365_v31 = vadd.f32 %v713_v16, %v364_v27 }
 0x13d   : > { %v350_v32 = vadd.f32 %v715_v17, %v349_v29 }
 0x13e   : > { %v369_v36 = vsel %vm368_vm12, %v713_v16, %v365_v31 }
 0x13f   : > { %v354_v38 = vsel %vm353_vm13, %v715_v17, %v350_v32  ;;  %v374_v39 = vsel %vm371_vm14, %v373_v33, %v369_v36  ;;  %vm322_vm13 = vcmp.lt.s32.totalorder %v316_v5, 15 }
 0x140   : > { %430 = vrot.lane.b32.xlu2 %v301_v11, %s844_s29  ;;  %v359_v40 = vsel %vm356_vm15, %v358_v34, %v354_v38  ;;  %v375_v41 = vmul.f32 %v374_v39, %v345_v35  ;;  %vm1007_vm1 = vmand %vm322_vm13, %vm965_vm3 }
 0x141   : > { %v360_v42 = vmul.f32 %v359_v40, %v344_v37 }
 0x142   : > { %380 = vrot.lane.b32.xlu1 %v375_v41, %s844_s29 }
 0x143   : > { %378 = vrot.lane.b32.xlu0 %v360_v42, %s844_s29 }
 0x14b   : > { %432 = vrot.lane.b32.xlu0 %v313_v9, %s844_s29  ;;  %s502_s29 = sshll.u32 %s992_s8, 4  ;;  %s1036_s29 = int_to_ptr.vmem [resolvable:$true] %s502_s29 }
 0x18a   : > { %v391_v43 = vpop.permute.xlu2 %390 }
 0x18b   : > { %716 = vrcp.f32 %v391_v43  ;;  %v407_v55 = vand.u32 2147483648, %v391_v43  ;;  %vm401_vm7 = vweird.f32 %v391_v43  ;;  %v405_v58 = vand.u32 2147483647, %v391_v43 }
 0x18d   : > { %v408_v60 = vor.u32 1.1754944e-38, %v407_v55  ;;  %vm406_vm9 = vcmp.eq.f32.partialorder %v405_v58, 8.507059e+37 }
 0x191   : > { %v717_v46 = vpop.eup %716 }
 0x192   : > { %v397_v47 = vmul.f32 %v717_v46, %v391_v43  ;;  %v958_v48 = vpop.permute.xlu2 %336  ;;  %vm402_vm5 = vweird.f32 %v717_v46 }
 0x193   : > { %vm403_vm8 = vmor %vm401_vm7, %vm402_vm5  ;;  %vm339_vm0 = vcmp.ne.s32.totalorder %v958_v48, 0 }
 0x194   : > { %v398_v50 = vsub.f32 1.0, %v397_v47  ;;  %vm341_vm3 = vmand %vm1007_vm1, %vm339_vm0 }
 0x196   : > { %v399_v51 = vmul.f32 %v717_v46, %v398_v50 }
 0x198   : > { %v400_v54 = vadd.f32 %v717_v46, %v399_v51 }
 0x19a   : > { %v431_v56 = vpop.permute.xlu2 %430  ;;  %v404_v59 = vsel %vm403_vm8, %v717_v46, %v400_v54 }
 0x19b   : > { %v436_v57 = vsel %vm971_vm4, %v431_v56, 0.0  ;;  %v409_v61 = vsel %vm406_vm9, %v408_v60, %v404_v59 }
 0x19c   : > { %439 = vst.msk [vmem:[%s978_s7] sm:$0xff] %vm438_vm6, %v436_v57  ;;  %v410_v1 = vmul.f32 %v409_v61, %v386_v63 }
 0x1a1   : > { %v393_v62 = vpop.permute.xlu0 %392 }
 0x1a2   : > { %v335_v0 = vpop.permute.xlu1 %334  ;;  %718 = vrcp.f32 %v393_v62  ;;  %v422_v7 = vand.u32 2147483648, %v393_v62  ;;  %v420_v9 = vand.u32 2147483647, %v393_v62  ;;  %vm416_vm14 = vweird.f32 %v393_v62 }
 0x1a3   : > { %vm338_vm10 = vcmp.ne.s32.totalorder %v335_v0, 0 }
 0x1a4   : > { %vm985_vm11 = vmand %vm971_vm4, %vm338_vm10  ;;  %v423_v11 = vor.u32 1.1754944e-38, %v422_v7  ;;  %vm421_vm2 = vcmp.eq.f32.partialorder %v420_v9, 8.507059e+37 }
 0x1a5   : > { %v426_v3 = vsel %vm985_vm11, %v410_v1, 0.0 }
 0x1a6   : > { %443 = vst.msk [vmem:[%s992_s8] sm:$0xff] %vm438_vm6, %v426_v3 }
 0x1a8   : > { %v719_v24 = vpop.eup %718 }
 0x1a9   : > { %v412_v4 = vmul.f32 %v719_v24, %v393_v62  ;;  %vm417_vm12 = vweird.f32 %v719_v24 }
 0x1aa   : > { %vm418_vm15 = vmor %vm416_vm14, %vm417_vm12 }
 0x1ab   : > { %v413_v6 = vsub.f32 1.0, %v412_v4 }
 0x1ad   : > { %v414_v8 = vmul.f32 %v719_v24, %v413_v6 }
 0x1af   : > { %v415_v10 = vadd.f32 %v719_v24, %v414_v8 }
 0x1b1   : > { %v419_v14 = vsel %vm418_vm15, %v719_v24, %v415_v10 }
 0x1b2   : > { %v424_v15 = vsel %vm421_vm2, %v423_v11, %v419_v14 }
 0x1b3   : > { %v425_v16 = vmul.f32 %v424_v15, %v387_v13 }
 0x1b4   : > { %v381_v23 = vpop.permute.xlu1 %380 }
 0x1b5   : > { %v385_v17 = vsel %vm341_vm3, %v381_v23, 1.0  ;;  %v427_v18 = vsel %vm341_vm3, %v425_v16, 0.0  ;;  %v379_v19 = vpop.permute.xlu0 %378 }
 0x1b6   : > { %442 = vst.msk [vmem:[%s174_s10 + $0x8] sm:$0xff] %vm438_vm6, %v385_v17  ;;  %v384_v20 = vsel %vm985_vm11, %v379_v19, 1.0 }
 0x1b7   : > { %444 = vst.msk [vmem:[%s992_s8 + $0x8] sm:$0xff] %vm438_vm6, %v427_v18  ;;  %s740_s8 = scalar_lea.hbm %s1122_s2, 32 }
 0x1b8   : > { %441 = vst.msk [vmem:[%s174_s10] sm:$0xff] %vm438_vm6, %v384_v20  ;;  %p742_p1 = scmp.lt.s32.totalorder %s740_s8, %s736_s9 }
 0x1ba   : > { %p743_p2 = por %p742_p1, %p741_p0 }
 0x1bc   : > { %p744_p3 = pnand %p743_p2, %p739_p13 }
 0x1be   : > { %747 = shalt.err (!%p744_p3)
}
 0x1bf   : > { %s848_s10 = smov 128   ;;  %s849_s25 = smov 8  }
 0x1c0   : > { %654 = dma.vmem_to_hbm [thread:$0]  (%p910_p5), %s1018_s11, 256, %s488_s30, %s1043_s26, %s848_s10, %s848_s10, %s849_s25  }
 0x1c1   : > { %s762_s19 = sshra.s32 %s505_s4, 4  ;;  %s768_s28 = scalar_lea.hbm %s1123_s3, 32  ;;  %s763_s19 = int_to_ptr.hbm [resolvable:$true] %s762_s19 }
 0x1c2   : > { %s764_s17 = scalar_lea.hbm %s763_s19, 16  ;;  %p769_p9 = scmp.lt.s32.totalorder %s763_s19, %s1123_s3 }
 0x1c3   : > { %p765_p4 = scmp.ne.s32.totalorder %s763_s19, %s764_s17  ;;  %p770_p10 = scmp.lt.s32.totalorder %s768_s28, %s764_s17 }
 0x1c5   : > { %p766_p7 = pnand %p765_p4, %p910_p5  ;;  %p771_p11 = por %p770_p10, %p769_p9 }
 0x1c7   : > { %p767_p8 = pneg %p766_p7 }
 0x1c9   : > { %p772_p12 = pnand %p771_p11, %p767_p8 }
 0x1cb   : > { %775 = shalt.err (!%p772_p12)
}
 0x1cc   : > { %655 = dma.vmem_to_hbm [thread:$0]  (%p910_p5), %s1036_s29, 256, %s505_s4, %s1043_s26, %s848_s10, %s848_s10, %s849_s25   ;;  %v433_v21 = vpop.permute.xlu0 %432 }
 0x1cd   : > { %v437_v22 = vsel %vm1007_vm1, %v433_v21, 0.0  ;;  %s446_s11 = scalar_lea.sflag [#allocation3], %s165_s5  ;;  %s790_s30 = sshra.s32 %s471_s24, 4  ;;  %s791_s30 = int_to_ptr.hbm [resolvable:$true] %s790_s30 }
 0x1ce   : > { %440 = vst.msk [vmem:[%s978_s7 + $0x8] sm:$0xff] %vm438_vm6, %v437_v22  ;;  %s792_s6 = scalar_lea.hbm %s791_s30, 16  ;;  %s796_s4 = scalar_lea.hbm %s1121_s1, 32 }
 0x1cf   : > { %p793_p13 = scmp.ne.s32.totalorder %s791_s30, %s792_s6  ;;  %p797_p2 = scmp.lt.s32.totalorder %s791_s30, %s1121_s1 }
 0x1d0   : > { %p798_p3 = scmp.lt.s32.totalorder %s796_s4, %s792_s6 }
 0x1d1   : > { %p794_p0 = pnand %p793_p13, %p910_p5 }
 0x1d2   : > { %p799_p4 = por %p798_p3, %p797_p2 }
 0x1d3   : > { %p795_p1 = pneg %p794_p0 }
 0x1d5   : > { %p800_p7 = pnand %p799_p4, %p795_p1 }
 0x1d7   : > { %803 = shalt.err (!%p800_p7)
}
 0x1d8   : > { %653 = dma.vmem_to_hbm [thread:$0]  (%p910_p5), %s469_s20, 256, %s471_s24, %s446_s11, %s848_s10, %s848_s10, %s849_s25  }
 0x1d9 PF: > { %p669_p8 = scmp.ge.s32.totalorder %s842_s15, 2  ;;  %s519_s5 = sand.u32 1, %s830_s12  }
 0x1da   : > { %s520_s7 = scalar_lea.sflag [#allocation3], %s519_s5 }
 0x1db   : > { %p660_p9 = pnand %p669_p8, %p914_p6 }
 0x1dd   : > { %p661_p10 = pneg %p660_p9 }
 0x1df   : > { %821 = dma.done.wait (%p661_p10), %s520_s7, 256  }
 0x1e0   : > { %823 = vsyncadd (%p661_p10), %s520_s7, 4294967040  ;;  %s1135_s27 = sadd.s32 4294967294, %s842_s15  }
 0x1e1   : > { %s529_s9 = sand.u32 1, %s1135_s27  }
 0x1e2   : > { %s530_s22 = scalar_lea.sflag [#allocation5], %s529_s9 }
 0x1e3   : > { %825 = dma.done.wait (%p661_p10), %s530_s22, 512  }
 0x1e4   : > { %827 = vsyncadd (%p661_p10), %s530_s22, 4294966784  ;;  %p17_p5 = scmp.ge.s32.totalorder %s895_s18, 4   ;;  %s1136_s12 = smov %s834_s13 }
 0x1e5   : > { %s1137_s13 = smov %s838_s14  ;;  %s1138_s14 = smov %s908_s21 }
 0x1e6   : > { %s1139_s15 = smov %s895_s18  ;;  %19 = sbr.rel (!%p17_p5) target bundleno = 5 (0x5), region = 91 }
 0x1eb   :  { %546 = vsyncpa [#allocation3], 1 }
 0x1ec   :  { %548 = vsyncpa [#allocation3 + $0x1], 1 }
 0x1ed   :  { %549 = vsyncpa [#allocation5], 1 }
 0x1ee   :  { %551 = vsyncpa [#allocation5 + $0x1], 1 }

</bundles_post_ra>
